<compile_context>
chip_gen: v7x
topology: tpu7x:2x2x1
jax: 0.10.0
libtpu: 0.0.40
codegen_flags: <defaults>
</compile_context>

<pallas_src>
import functools

import jax
import jax.numpy as jnp
from jax.experimental import pallas as pl
from jax.experimental.pallas import tpu as pltpu


EPS = 1e-7

# VMEM sizing: ~4 resident buffers (double-buffered input + output) per block.
_PER_BLOCK_VMEM_BUDGET = 8 * 1024 * 1024      # bytes per block -> ~32 MiB resident
_VMEM_LIMIT_BYTES = 48 * 1024 * 1024          # scoped limit; safe on v5e/v6e/v7x
_MAX_ROW_TILE = 1024
_MIN_GRID_STEPS = 8                           # keep pipeline + both v7x TCs busy


def _choose_row_tile(rows: int, d_model: int, itemsize: int) -> int:
    """Pick a sublane-aligned row tile sized for VMEM and grid depth."""
    packing = max(1, 4 // itemsize)           # rows packed per 32-bit sublane
    min_tile = 8 * packing                    # 8 for f32, 16 for bf16, 32 for i8
    if rows <= min_tile:
        return rows                           # single full-extent block (allowed)

    max_by_vmem = max(min_tile, _PER_BLOCK_VMEM_BUDGET // max(1, d_model * itemsize))
    tile = min(_MAX_ROW_TILE, max_by_vmem, rows)

    # On big problems, keep at least a handful of grid steps.
    if rows >= _MIN_GRID_STEPS * min_tile:
        tile = min(tile, max(min_tile, rows // _MIN_GRID_STEPS))

    # Round down to a sublane-packed multiple.
    tile = max(min_tile, (tile // min_tile) * min_tile)
    return tile


def _layernorm_kernel(params_ref, x_ref, o_ref, *, eps: float, d_model: int):
    # params_ref: SMEM f32[2] = [alpha, bias]
    # x_ref / o_ref: VMEM [row_tile, d_model]
    alpha = params_ref[0]
    bias = params_ref[1]

    x = x_ref[...].astype(jnp.float32)
    mean = jnp.mean(x, axis=-1, keepdims=True)
    centered = x - mean
    # torch.std is unbiased: divide by (N - 1); guard N == 1.
    denom = float(max(d_model - 1, 1))
    var = jnp.sum(centered * centered, axis=-1, keepdims=True) * (1.0 / denom)
    std = jnp.sqrt(var)
    # Fold the divide into a column-wide reciprocal + one tile-wide multiply.
    inv = alpha * pl.reciprocal(std + eps, approx=False)     # (row_tile, 1)
    o_ref[...] = (centered * inv + bias).astype(o_ref.dtype)


def layer_norm_pallas(x: jax.Array, alpha: jax.Array, bias: jax.Array,
                      eps: float = EPS) -> jax.Array:
    """LayerNormalizationBlock.forward, computed in a Pallas TPU kernel."""
    orig_shape = x.shape
    d_model = orig_shape[-1]
    x2d = x.reshape(-1, d_model)
    rows = x2d.shape[0]

    itemsize = jnp.dtype(x.dtype).itemsize
    row_tile = _choose_row_tile(rows, d_model, itemsize)
    grid = (pl.cdiv(rows, row_tile),)   # partial last block handled by Pallas

    params = jnp.concatenate([
        jnp.asarray(alpha, jnp.float32).reshape(1),
        jnp.asarray(bias, jnp.float32).reshape(1),
    ])

    kernel = functools.partial(_layernorm_kernel, eps=eps, d_model=d_model)

    out2d = pl.pallas_call(
        kernel,
        out_shape=jax.ShapeDtypeStruct((rows, d_model), x.dtype),
        grid_spec=pltpu.PrefetchScalarGridSpec(
            num_scalar_prefetch=0,
            grid=grid,
            in_specs=[
                pl.BlockSpec(memory_space=pltpu.MemorySpace.SMEM),     # params
                pl.BlockSpec((row_tile, d_model), lambda i: (i, 0)),   # x tile
            ],
            out_specs=pl.BlockSpec((row_tile, d_model), lambda i: (i, 0)),
        ),
        compiler_params=pltpu.CompilerParams(
            dimension_semantics=("parallel",),
            vmem_limit_bytes=_VMEM_LIMIT_BYTES,
        ),
    )(params, x2d)

    return out2d.reshape(orig_shape)


def decoder_sequence_block(x, encoder_output, src_mask, tgt_mask,
                           decoder_blocks, alpha, bias, eps: float = EPS):
    """DecoderSequenceBlock.forward.

    decoder_blocks: list of callables (x, encoder_output, src_mask, tgt_mask) -> x
    """
    # TODO(synk): decoder_blocks is an externally injected nn.ModuleList whose
    # architecture is not defined in the reference source; blocks are applied
    # here as opaque callables (plain-JAX glue), identity stack by default.
    for block in decoder_blocks:
        x = block(x, encoder_output, src_mask, tgt_mask)
    return layer_norm_pallas(x, alpha, bias, eps)


def _layer_norm_ref(x, alpha, bias, eps=EPS):
    x = x.astype(jnp.float32)
    mean = jnp.mean(x, axis=-1, keepdims=True)
    var = jnp.sum((x - mean) ** 2, axis=-1, keepdims=True) / max(x.shape[-1] - 1, 1)
    std = jnp.sqrt(var)
    return alpha.reshape(()) * (x - mean) / (std + eps) + bias.reshape(())


if __name__ == "__main__":
    key = jax.random.PRNGKey(0)
    kx, ke = jax.random.split(key)

    batch, seq, d_model = 2, 8, 32
    x = jax.random.normal(kx, (batch, seq, d_model), dtype=jnp.float32)
    encoder_output = jax.random.normal(ke, (batch, seq, d_model), dtype=jnp.float32)
    src_mask = jnp.ones((batch, 1, 1, seq), dtype=jnp.float32)
    tgt_mask = jnp.tril(jnp.ones((seq, seq), dtype=jnp.float32))[None, None]

    # Deterministic parameter init (matches nn.Parameter(torch.ones(1)/zeros(1))).
    alpha = jnp.ones((1,), dtype=jnp.float32)
    bias = jnp.zeros((1,), dtype=jnp.float32)

    # Identity decoder stack (the ModuleList is caller-provided in the module).
    decoder_blocks = []

    out = decoder_sequence_block(x, encoder_output, src_mask, tgt_mask,
                                 decoder_blocks, alpha, bias)
    out = jax.block_until_ready(out)

    ref = _layer_norm_ref(x, alpha, bias)
    assert out.shape == x.shape, (out.shape, x.shape)
    assert jnp.allclose(out, ref, atol=1e-5, rtol=1e-5), "mismatch vs reference"

    print("KERNEL_OK")
</pallas_src>

<mosaic_0001>
module attributes {stable_mosaic.version = 11 : i64} {
  func.func @_layernorm_kernel(%arg0: i32, %arg1: memref<2xf32, #tpu.memory_space<smem>>, %arg2: memref<16x32xf32, #tpu.memory_space<vmem>>, %arg3: memref<16x32xf32, #tpu.memory_space<vmem>>) attributes {dimension_semantics = [#tpu.dimension_semantics<parallel>], iteration_bounds = array<i64: 1>, scalar_prefetch = 0 : i64, scratch_operands = 0 : i64, tpu.core_type = #tpu.core_type<tc>, window_params = [{transform_indices = @transform_0, window_bounds = array<i64: 2>}, {transform_indices = @transform_1, window_bounds = array<i64: 16, 32>}, {transform_indices = @transform_2, window_bounds = array<i64: 16, 32>}]} {
    %c0 = arith.constant 0 : index
    %0 = memref.load %arg1[%c0] : memref<2xf32, #tpu.memory_space<smem>>
    %c1 = arith.constant 1 : index
    %1 = memref.load %arg1[%c1] : memref<2xf32, #tpu.memory_space<smem>>
    %c0_0 = arith.constant 0 : index
    %c0_1 = arith.constant 0 : index
    %2 = vector.load %arg2[%c0_0, %c0_1] : memref<16x32xf32, #tpu.memory_space<vmem>>, vector<16x32xf32>
    %cst = arith.constant dense<0.000000e+00> : vector<16xf32>
    %3 = vector.multi_reduction <add>, %2, %cst [1] : vector<16x32xf32> to vector<16xf32>
    %4 = vector.shape_cast %3 : vector<16xf32> to vector<16x1xf32>
    %cst_2 = arith.constant 3.200000e+01 : f32
    %5 = vector.broadcast %cst_2 : f32 to vector<16x1xf32>
    %6 = arith.divf %4, %5 : vector<16x1xf32>
    %7 = vector.broadcast %6 : vector<16x1xf32> to vector<16x32xf32>
    %8 = arith.subf %2, %7 : vector<16x32xf32>
    %9 = arith.mulf %8, %8 : vector<16x32xf32>
    %cst_3 = arith.constant dense<0.000000e+00> : vector<16xf32>
    %10 = vector.multi_reduction <add>, %9, %cst_3 [1] : vector<16x32xf32> to vector<16xf32>
    %11 = vector.shape_cast %10 : vector<16xf32> to vector<16x1xf32>
    %cst_4 = arith.constant 0.0322580636 : f32
    %12 = vector.broadcast %cst_4 : f32 to vector<16x1xf32>
    %13 = arith.mulf %11, %12 : vector<16x1xf32>
    %14 = math.sqrt %13 : vector<16x1xf32>
    %cst_5 = arith.constant 1.000000e-07 : f32
    %15 = vector.broadcast %cst_5 : f32 to vector<16x1xf32>
    %16 = arith.addf %14, %15 : vector<16x1xf32>
    %17 = tpu.reciprocal %16 : vector<16x1xf32> -> vector<16x1xf32>
    %18 = vector.broadcast %0 : f32 to vector<16x1xf32>
    %19 = arith.mulf %18, %17 : vector<16x1xf32>
    %20 = vector.broadcast %19 : vector<16x1xf32> to vector<16x32xf32>
    %21 = arith.mulf %8, %20 : vector<16x32xf32>
    %22 = vector.broadcast %1 : f32 to vector<16x32xf32>
    %23 = arith.addf %21, %22 : vector<16x32xf32>
    %c0_6 = arith.constant 0 : index
    %c0_7 = arith.constant 0 : index
    %24 = vector.load %arg3[%c0_6, %c0_7] : memref<16x32xf32, #tpu.memory_space<vmem>>, vector<16x32xf32>
    tpu.vector_store %arg3[%c0_6, %c0_7], %23 {strides = array<i32>} : memref<16x32xf32, #tpu.memory_space<vmem>>, vector<16x32xf32>,
    return
  }
  func.func @transform_0(%arg0: i32) -> i32 {
    %c0_i32 = arith.constant 0 : i32
    %c0_i32_0 = arith.constant 0 : i32
    return %c0_i32 : i32
  }
  func.func @transform_1(%arg0: i32) -> (i32, i32) {
    %c0_i32 = arith.constant 0 : i32
    %c0_i32_0 = arith.constant 0 : i32
    return %arg0, %c0_i32 : i32, i32
  }
  func.func @transform_2(%arg0: i32) -> (i32, i32) {
    %c0_i32 = arith.constant 0 : i32
    %c0_i32_0 = arith.constant 0 : i32
    return %arg0, %c0_i32 : i32, i32
  }
}

</mosaic_0001>

<bundles_post_ra>
// kernel: tpu_custom_call.1
= control target key start
LH: loop header
LB: loop body
LE: loop exit
PB: predicated region body
PF: predicated region fallthrough
CT: control target
= control target key end

     0   :  { %7 = vsyncpa [#allocation5], 0  ;;  %s251_s0 = inlined_call_operand.hbm [shape: f32[2], index: 0, kind: input, shape index: {}]   ;;  %s252_s1 = inlined_call_operand.hbm [shape: f32[16,32], index: 1, kind: input, shape index: {}]   ;;  %s253_s2 = inlined_call_operand.hbm [shape: f32[16,32], index: 2, kind: output, shape index: {}]  }
   0x1   :  { %8 = vsyncpa [#allocation3], 0 }
   0x2   :  { %9 = vsyncpa [#allocation4], 0  ;;  %s123_s11 = scalar_lea.hbm %s251_s0, 16 }
   0x3   :  { %p124_p0 = scmp.ne.s32.totalorder %s251_s0, %s123_s11  ;;  %p127_p1 = scmp.lt.u32.totalorder %s123_s11, %s251_s0 }
   0x5   :  { %p129_p2 = pnand %p127_p1, %p124_p0 }
   0x7   :  { %132 = shalt.err (!%p129_p2)
}
   0x8   :  { %s183_s16 = smov [#allocation2]   ;;  %s184_s19 = smov [#allocation6]  }
   0x9   :  { %17 = dma.hbm_to_smem %s251_s0, 16, %s183_s16, [#allocation5]  }
   0xa   :  { %s23_s20 = sshll.u32 %s184_s19, 4  ;;  %s133_s23 = scalar_lea.hbm %s252_s1, 256  ;;  %s24_s20 = int_to_ptr.vmem [resolvable:$true] %s23_s20 }
   0xb   :  { %p134_p3 = scmp.ne.s32.totalorder %s252_s1, %s133_s23  ;;  %p137_p4 = scmp.lt.u32.totalorder %s133_s23, %s252_s1 }
   0xd   :  { %p139_p5 = pnand %p137_p4, %p134_p3 }
   0xf   :  { %142 = shalt.err (!%p139_p5)
}
  0x10   :  { %s143_s28 = scalar_lea.vmem %s24_s20, 256  ;;  %p148_p7 = scmp.lt.s32.totalorder %s24_s20, %s24_s20 }
  0x11   :  { %p144_p6 = scmp.ne.s32.totalorder %s24_s20, %s143_s28  ;;  %p149_p8 = scmp.lt.s32.totalorder %s143_s28, %s143_s28 }
  0x13   :  { %p150_p9 = por %p149_p8, %p148_p7 }
  0x15   :  { %p151_p10 = pnand %p150_p9, %p144_p6 }
  0x17   :  { %154 = shalt.err (!%p151_p10)
}
  0x18   :  { %s185_s0 = smov 128   ;;  %s186_s29 = smov 8  }
  0x19   :  { %29 = dma.hbm_to_vmem [thread:$0]  %s252_s1, 256, %s24_s20, [#allocation3], %s185_s0, %s185_s0, %s186_s29  }
  0x1a   :  { %177 = dma.done.wait [#allocation5], 16  }
  0x1b   :  { %178 = vsyncadd [#allocation5], 4294967280 }
  0x1c   :  { %179 = dma.done.wait [#allocation3], 256  }
  0x1d   :  { %180 = vsyncadd [#allocation3], 4294967040 }
  0x1e   :  { %36 = sfence }
  0x1f   :  { %v39_v0 = vld [vmem:[#allocation6] sm:$0xff]  ;;  %vm41_vm0 = vcmask 261120   ;;  %v40_v1 = vld [vmem:[#allocation6 + $0x8] sm:$0xff]  ;;  %s37_s1 = sld [smem:[#allocation2]]  ;;  %s109_s4 = sld [smem:[#allocation2 + $0x1]] }
  0x20   :  { %v42_v2 = vsel %vm41_vm0, %v39_v0, 0.0  ;;  %v45_v3 = vsel %vm41_vm0, %v40_v1, 0.0  ;;  %s187_s5 = smov [#allocation7]  }
  0x21   :  { %43 = vadd.xlane.f32.xlu0 %v42_v2  ;;  %s96_s6 = sshll.u32 %s187_s5, 4  ;;  %s97_s6 = int_to_ptr.vmem [resolvable:$true] %s96_s6 }
  0x22   :  { %s155_s7 = scalar_lea.vmem %s97_s6, 256  ;;  %p160_p12 = scmp.lt.s32.totalorder %s97_s6, %s97_s6 }
  0x23   :  { %p156_p11 = scmp.ne.s32.totalorder %s97_s6, %s155_s7  ;;  %p161_p13 = scmp.lt.s32.totalorder %s155_s7, %s155_s7 }
  0x25   :  { %46 = vadd.xlane.f32.xlu0 %v45_v3  ;;  %v81_v30 = vstv %s37_s1  ;;  %v86_v33 = vstv %s109_s4  ;;  %p162_p0 = por %p161_p13, %p160_p12 }
  0x27   :  { %p163_p1 = pnand %p162_p0, %p156_p11 }
  0xae   :  { %v44_v4 = vpop.xlane.xlu0 %43 }
  0xaf   :  { %v49_v5 = vmul.f32 0.03125, %v44_v4 }
  0xb1   :  { %v51_v6 = vsub.f32 %v39_v0, %v49_v5 }
  0xb2   :  { %v47_v7 = vpop.xlane.xlu0 %46 }
  0xb3   :  { %v50_v8 = vmul.f32 0.03125, %v47_v7  ;;  %v53_v9 = vmul.f32 %v51_v6, %v51_v6 }
  0xb5   :  { %v52_v10 = vsub.f32 %v40_v1, %v50_v8  ;;  %v55_v11 = vsel %vm41_vm0, %v53_v9, 0.0 }
  0xb6   :  { %56 = vadd.xlane.f32.xlu1 %v55_v11 }
  0xb7   :  { %v54_v12 = vmul.f32 %v52_v10, %v52_v10 }
  0xb9   :  { %v58_v13 = vsel %vm41_vm0, %v54_v12, 0.0 }
  0xba   :  { %59 = vadd.xlane.f32.xlu1 %v58_v13 }
 0x143   :  { %v57_v14 = vpop.xlane.xlu1 %56 }
 0x144   :  { %v61_v15 = vmul.f32 0.032258064, %v57_v14 }
 0x146   :  { %115 = vrsqrt.f32 %v61_v15  ;;  %vm65_vm1 = vcmp.eq.f32.partialorder %v61_v15, inf  ;;  %v68_v20 = vand.u32 2147483648, %v61_v15  ;;  %vm67_vm2 = vcmp.eq.f32.partialorder %v61_v15, 0.0 }
 0x147   :  { %v60_v16 = vpop.xlane.xlu1 %59 }
 0x148   :  { %v62_v17 = vmul.f32 0.032258064, %v60_v16 }
 0x14a   :  { %117 = vrsqrt.f32 %v62_v17  ;;  %vm72_vm3 = vcmp.eq.f32.partialorder %v62_v17, inf  ;;  %v75_v26 = vand.u32 2147483648, %v62_v17  ;;  %vm74_vm4 = vcmp.eq.f32.partialorder %v62_v17, 0.0 }
 0x150   :  { %v116_v18 = vpop.eup %115 }
 0x151   :  { %v64_v19 = vmul.f32 %v116_v18, %v61_v15 }
 0x153   :  { %v66_v21 = vsel %vm65_vm1, %v61_v15, %v64_v19 }
 0x154   :  { %v118_v22 = vpop.eup %117  ;;  %v69_v23 = vsel %vm67_vm2, %v68_v20, %v66_v21 }
 0x155   :  { %v71_v24 = vmul.f32 %v118_v22, %v62_v17  ;;  %v77_v25 = vadd.f32 1e-07, %v69_v23 }
 0x157   :  { %v73_v27 = vsel %vm72_vm3, %v62_v17, %v71_v24  ;;  %119 = vrcp.f32 %v77_v25 }
 0x158   :  { %v76_v28 = vsel %vm74_vm4, %v75_v26, %v73_v27 }
 0x159   :  { %v78_v29 = vadd.f32 1e-07, %v76_v28 }
 0x15b   :  { %121 = vrcp.f32 %v78_v29 }
 0x161   :  { %v120_v31 = vpop.eup %119 }
 0x162   :  { %v82_v32 = vmul.f32 %v120_v31, %v81_v30 }
 0x164   :  { %v84_v34 = vmul.f32 %v82_v32, %v51_v6 }
 0x165   :  { %v122_v35 = vpop.eup %121 }
 0x166   :  { %v83_v36 = vmul.f32 %v122_v35, %v81_v30  ;;  %v87_v37 = vadd.f32 %v86_v33, %v84_v34 }
 0x168   :  { %v85_v38 = vmul.f32 %v83_v36, %v52_v10  ;;  %89 = vst.msk [vmem:[#allocation7] sm:$0xff] %vm41_vm0, %v87_v37 }
 0x16a   :  { %v88_v39 = vadd.f32 %v86_v33, %v85_v38 }
 0x16c   :  { %90 = vst.msk [vmem:[#allocation7 + $0x8] sm:$0xff] %vm41_vm0, %v88_v39 }
 0x16d   :  { %166 = shalt.err (!%p163_p1)
}
 0x16e   :  { %s167_s10 = scalar_lea.hbm %s253_s2, 256 }
 0x16f   :  { %p168_p2 = scmp.ne.s32.totalorder %s253_s2, %s167_s10  ;;  %p171_p3 = scmp.lt.u32.totalorder %s167_s10, %s253_s2 }
 0x171   :  { %p173_p4 = pnand %p171_p3, %p168_p2 }
 0x173   :  { %176 = shalt.err (!%p173_p4)
}
 0x174   :  { %102 = dma.vmem_to_hbm [thread:$0]  %s97_s6, 256, %s253_s2, [#allocation4], %s185_s0, %s185_s0, %s186_s29  }
 0x175   :  { %181 = dma.done.wait [#allocation4], 256  }
 0x176   :  { %182 = vsyncadd [#allocation4], 4294967040 }
 0x177   :  { %106 = vsyncpa [#allocation3], 1 }
 0x178   :  { %107 = vsyncpa [#allocation4], 1 }
 0x179   :  { %108 = vsyncpa [#allocation5], 1 }

</bundles_post_ra>
